<compile_context>
chip_gen: v6e
topology: v6e:2x2x1
jax: 0.10.0
libtpu: 0.0.40
codegen_flags: <defaults>
</compile_context>

<pallas_src>
import jax
import jax.numpy as jnp
from jax.experimental import pallas as pl
from jax.experimental.pallas import tpu as pltpu

CPAD = 128                       # lane-dense channel padding for the GEMM output side
TM_MAX = 512                     # max GEMM row tile per grid step
VMEM_LIMIT = 32 * 1024 * 1024    # explicit scoped-VMEM budget (v5e default is 16 MiB)


def _round_up(x, m):
    return (x + m - 1) // m * m


def _pick_tm(m):
    """Choose the GEMM row tile.

    - multiple of 8 (sublane aligned), <= TM_MAX
    - divides the 8-rounded row count when possible, so the 9x-inflated patch
      matrix never gets jnp.pad-copied just to round M
    - <= M/2 when the row count allows it, so every launch has >= 2 grid steps
      and the parallel M axis can shard across both v7x TensorCores
    """
    m8 = _round_up(m, 8)
    cap = m8 if m8 < 16 else min(TM_MAX, _round_up(m8 // 2, 8))
    cap = max(8, cap - cap % 8)
    tm = next((t for t in range(cap, 7, -8) if m8 % t == 0), 8)
    if tm < cap // 2:            # no useful divisor -> accept a small ragged-tail pad
        tm = cap
    return tm, _round_up(m8, tm)


# ------------------------------ Pallas kernel -------------------------------

def _gemm_bias_relu_kernel(p_ref, w_ref, b_ref, o_ref):
    """One row-tile of a folded RepVGG block: patches @ W + bias, then ReLU.

    p_ref: (TM, K)     bf16 im2col patches (K = 9 * cin_pad, real channels)
    w_ref: (K, CPAD)   bf16 folded 3x3 kernel reshaped to 2D (out-chan padded)
    b_ref: (1, CPAD)   f32 folded bias (zero padded)
    o_ref: (TM, CPAD)  bf16 output rows (lane dense -> unmasked stores)
    """
    acc = jnp.dot(p_ref[...], w_ref[...], preferred_element_type=jnp.float32)
    o_ref[...] = jnp.maximum(acc + b_ref[...], 0.0).astype(o_ref.dtype)


def _gemm_bias_relu(patches, w2d, bias_row):
    m, k = patches.shape
    cpad = w2d.shape[1]
    tm, m_pad = _pick_tm(m)
    if m_pad != m:
        # Only hit when M is not a multiple of 8 / tm (never for the shapes in
        # __main__); pads just the small ragged tail.
        patches = jnp.pad(patches, ((0, m_pad - m), (0, 0)))
    out = pl.pallas_call(
        _gemm_bias_relu_kernel,
        out_shape=jax.ShapeDtypeStruct((m_pad, cpad), jnp.bfloat16),
        grid=(m_pad // tm,),
        in_specs=[
            pl.BlockSpec((tm, k), lambda i: (i, 0)),
            # constant index maps -> fetched once, VMEM-resident across the grid.
            # (pipeline_mode=pl.Buffered(1) would also drop the idle second
            #  buffer; left at default for portability — weights are small now.)
            pl.BlockSpec((k, cpad), lambda i: (0, 0)),
            pl.BlockSpec((1, cpad), lambda i: (0, 0)),
        ],
        out_specs=pl.BlockSpec((tm, cpad), lambda i: (i, 0)),
        compiler_params=pltpu.CompilerParams(
            dimension_semantics=("parallel",),
            vmem_limit_bytes=VMEM_LIMIT),
    )(patches, w2d, bias_row)
    return out[:m]


# ------------------------------- block wrapper -------------------------------

def _im2col(x_nhwc, stride):
    """3x3 / padding=1 / given stride im2col: (N,H,W,C) -> (N*Ho*Wo, 9*C)."""
    n, h, w, c = x_nhwc.shape
    s = int(stride)
    xp = jnp.pad(x_nhwc, ((0, 0), (1, 1), (1, 1), (0, 0)))
    ho = (h + 2 - 3) // s + 1
    wo = (w + 2 - 3) // s + 1
    cols = []
    for kh in range(3):
        for kw in range(3):
            cols.append(xp[:, kh:kh + (ho - 1) * s + 1:s,
                              kw:kw + (wo - 1) * s + 1:s, :])
    patches = jnp.concatenate(cols, axis=-1)          # (N, Ho, Wo, 9*C)
    return patches.reshape(n * ho * wo, 9 * c), ho, wo


def repvgg_block_forward(x_nhwc, p):
    # Slice the previous block's 128-wide output down to its real channel count
    # (real-cin K), pad only to the 8-sublane boundary the folded weights expect.
    x = x_nhwc[..., :p["cin"]]
    if p["cin_pad"] != p["cin"]:
        x = jnp.pad(x, ((0, 0), (0, 0), (0, 0), (0, p["cin_pad"] - p["cin"])))
    patches, ho, wo = _im2col(x, p["stride"])
    y = _gemm_bias_relu(patches, p["w2d"], p["bias_row"])   # (N*Ho*Wo, CPAD)
    return y.reshape(x.shape[0], ho, wo, p["w2d"].shape[1])


# ----------------------- parameter construction (glue) -----------------------

def _fuse_conv_bn(w_oihw, gamma, beta, mean, var, eps=1e-5):
    std = jnp.sqrt(var + eps)
    t = (gamma / std).reshape(-1, 1, 1, 1)
    return w_oihw * t, beta - mean * gamma / std


def _bn_params(key, c):
    k1, k2, k3, k4 = jax.random.split(key, 4)
    gamma = 1.0 + 0.1 * jax.random.normal(k1, (c,), jnp.float32)
    beta = 0.1 * jax.random.normal(k2, (c,), jnp.float32)
    mean = 0.1 * jax.random.normal(k3, (c,), jnp.float32)
    var = jnp.abs(jax.random.normal(k4, (c,), jnp.float32)) * 0.5 + 0.5
    return gamma, beta, mean, var


def make_block_params(key, cin, cout, stride):
    """RepVGGBlock params folded exactly as get_equivalent_kernel_bias (eval BN)."""
    cin_pad = _round_up(cin, 8)          # sublane-aligned real-cin K (block0: 3->8)
    cout_pad = CPAD                      # lane-dense output stores
    k = jax.random.split(key, 5)
    w3 = 0.1 * jax.random.normal(k[0], (cout, cin, 3, 3), jnp.float32)
    w1 = 0.1 * jax.random.normal(k[1], (cout, cin, 1, 1), jnp.float32)
    k3, b3 = _fuse_conv_bn(w3, *_bn_params(k[2], cout))
    k1_, b1 = _fuse_conv_bn(w1, *_bn_params(k[3], cout))
    kern = k3 + jnp.pad(k1_, ((0, 0), (0, 0), (1, 1), (1, 1)))   # 1x1 -> 3x3
    bias = b3 + b1
    if cin == cout and stride == 1:                               # rbr_identity
        id_k = jnp.zeros((cout, cin, 3, 3), jnp.float32).at[
            jnp.arange(cin), jnp.arange(cin), 1, 1].set(1.0)
        kid, bid = _fuse_conv_bn(id_k, *_bn_params(k[4], cin))
        kern = kern + kid
        bias = bias + bid
    w_hwio = jnp.transpose(kern, (2, 3, 1, 0))        # (3,3,cin,cout) f32 (reference)
    # channel-padded bf16 2D weight for the single-GEMM Pallas path
    w_pad = jnp.zeros((3, 3, cin_pad, cout_pad), jnp.float32)
    w_pad = w_pad.at[:, :, :cin, :cout].set(w_hwio)
    w2d = w_pad.reshape(9 * cin_pad, cout_pad).astype(jnp.bfloat16)
    bias_row = jnp.zeros((1, cout_pad), jnp.float32).at[0, :cout].set(bias)
    return dict(w2d=w2d, bias_row=bias_row, w_hwio=w_hwio, bias=bias,
                stride=int(stride), cin=cin, cin_pad=cin_pad, cout=cout)


def build_repvgg(key, num_blocks=(2, 1, 1),
                 width_multiplier=(0.25, 0.25, 0.25, 0.25),
                 strides=(2, 2, 2, 2, 2)):
    """Mirrors RepVGG.__init__ topology: last_layer='stage3', groups=1, use_se=False."""
    cfg = []
    in_planes = min(64, int(64 * width_multiplier[0]))
    cfg.append((3, in_planes, strides[0]))                        # stage0
    stage_planes = [int(64 * width_multiplier[0]),
                    int(128 * width_multiplier[1]),
                    int(256 * width_multiplier[2])]
    for planes, nb, st in zip(stage_planes, num_blocks, strides[1:4]):
        for s in [st] + [1] * (nb - 1):
            cfg.append((in_planes, planes, s))
            in_planes = planes
    keys = jax.random.split(key, len(cfg))
    return [make_block_params(kk, cin, cout, s)
            for kk, (cin, cout, s) in zip(keys, cfg)]


def repvgg_forward(x_nchw, params):
    x = jnp.transpose(x_nchw, (0, 2, 3, 1)).astype(jnp.bfloat16)  # NCHW -> NHWC bf16
    for p in params:
        x = repvgg_block_forward(x, p)
    out = x[..., :params[-1]["cout"]].astype(jnp.float32)         # drop channel padding
    return jnp.transpose(out, (0, 3, 1, 2))                       # NHWC -> NCHW


# --------------------------- pure-JAX references -----------------------------

def _reference_forward_f32(x_nchw, params):
    x = x_nchw
    for p in params:
        w_oihw = jnp.transpose(p["w_hwio"], (3, 2, 0, 1))
        y = jax.lax.conv_general_dilated(
            x, w_oihw, (p["stride"],) * 2, ((1, 1), (1, 1)),
            dimension_numbers=("NCHW", "OIHW", "NCHW"),
            precision=jax.lax.Precision.HIGHEST)
        x = jnp.maximum(y + p["bias"].reshape(1, -1, 1, 1), 0.0)
    return x


def _reference_forward_bf16(x_nchw, params):
    """Same bf16-operand / f32-accumulate quantization as the Pallas path."""
    x = jnp.transpose(x_nchw, (0, 2, 3, 1)).astype(jnp.bfloat16)
    for p in params:
        y = jax.lax.conv_general_dilated(
            x, p["w_hwio"].astype(jnp.bfloat16), (p["stride"],) * 2,
            ((1, 1), (1, 1)),
            dimension_numbers=("NHWC", "HWIO", "NHWC"),
            preferred_element_type=jnp.float32)
        x = jnp.maximum(y + p["bias"].reshape(1, 1, 1, -1),
                        0.0).astype(jnp.bfloat16)
    return jnp.transpose(x.astype(jnp.float32), (0, 3, 1, 2))


if __name__ == "__main__":
    key = jax.random.PRNGKey(0)
    kx, kp = jax.random.split(key)
    # Small RepVGG: width_multiplier=0.25 -> channels 16/16/32/64,
    # num_blocks=(2,1,1), all strides 2, last_layer='stage3'.  NCHW input.
    x = jax.random.normal(kx, (2, 3, 32, 32), jnp.float32)
    params = build_repvgg(kp)

    out = repvgg_forward(x, params)
    out = jax.block_until_ready(out)
    assert out.shape == (2, 64, 2, 2), out.shape

    # tight check against a reference with identical bf16/f32 quantization
    ref_q = _reference_forward_bf16(x, params)
    assert jnp.allclose(out, ref_q, rtol=1e-2, atol=1e-2), \
        float(jnp.max(jnp.abs(out - ref_q)))
    # looser sanity check against the full-precision f32 reference
    ref = _reference_forward_f32(x, params)
    assert jnp.allclose(out, ref, rtol=1e-1, atol=1e-1), \
        float(jnp.max(jnp.abs(out - ref)))
    print("KERNEL_OK")
</pallas_src>

<mosaic_0001>
module attributes {stable_mosaic.version = 11 : i64} {
  func.func @_gemm_bias_relu_kernel(%arg0: i32, %arg1: memref<256x72xbf16, #tpu.memory_space<vmem>>, %arg2: memref<72x128xbf16, #tpu.memory_space<vmem>>, %arg3: memref<1x128xf32, #tpu.memory_space<vmem>>, %arg4: memref<256x128xbf16, #tpu.memory_space<vmem>>) attributes {dimension_semantics = [#tpu.dimension_semantics<parallel>], iteration_bounds = array<i64: 2>, scalar_prefetch = 0 : i64, scratch_operands = 0 : i64, tpu.core_type = #tpu.core_type<tc>, window_params = [{transform_indices = @transform_0, window_bounds = array<i64: 256, 72>}, {pipeline_mode = #tpu.pipeline_mode<synchronous>, transform_indices = @transform_1, window_bounds = array<i64: 72, 128>}, {pipeline_mode = #tpu.pipeline_mode<synchronous>, transform_indices = @transform_2, window_bounds = array<i64: 1, 128>}, {transform_indices = @transform_3, window_bounds = array<i64: 256, 128>}]} {
    %c0 = arith.constant 0 : index
    %c0_0 = arith.constant 0 : index
    %0 = vector.load %arg1[%c0, %c0_0] : memref<256x72xbf16, #tpu.memory_space<vmem>>, vector<256x72xbf16>
    %c0_1 = arith.constant 0 : index
    %c0_2 = arith.constant 0 : index
    %1 = vector.load %arg2[%c0_1, %c0_2] : memref<72x128xbf16, #tpu.memory_space<vmem>>, vector<72x128xbf16>
    %cst = arith.constant dense<0.000000e+00> : vector<256x128xf32>
    %2 = tpu.matmul %0, %1, %cst {dimension_numbers = #tpu.dot_dimension_numbers<[1], [0], [0], [1], [0, 0, 1, 1], [], []>} : vector<256x72xbf16>, vector<72x128xbf16>, vector<256x128xf32> -> vector<256x128xf32>
    %c0_3 = arith.constant 0 : index
    %c0_4 = arith.constant 0 : index
    %3 = vector.load %arg3[%c0_3, %c0_4] : memref<1x128xf32, #tpu.memory_space<vmem>>, vector<1x128xf32>
    %4 = vector.broadcast %3 : vector<1x128xf32> to vector<256x128xf32>
    %5 = arith.addf %2, %4 : vector<256x128xf32>
    %cst_5 = arith.constant 0.000000e+00 : f32
    %6 = vector.broadcast %cst_5 : f32 to vector<256x128xf32>
    %7 = arith.maximumf %5, %6 : vector<256x128xf32>
    %8 = arith.truncf %7 : vector<256x128xf32> to vector<256x128xbf16>
    %c0_6 = arith.constant 0 : index
    %c0_7 = arith.constant 0 : index
    %9 = vector.load %arg4[%c0_6, %c0_7] : memref<256x128xbf16, #tpu.memory_space<vmem>>, vector<256x128xbf16>
    tpu.vector_store %arg4[%c0_6, %c0_7], %8 {strides = array<i32>} : memref<256x128xbf16, #tpu.memory_space<vmem>>, vector<256x128xbf16>,
    return
  }
  func.func @transform_0(%arg0: i32) -> (i32, i32) {
    %c0_i32 = arith.constant 0 : i32
    %c0_i32_0 = arith.constant 0 : i32
    return %arg0, %c0_i32 : i32, i32
  }
  func.func @transform_1(%arg0: i32) -> (i32, i32) {
    %c0_i32 = arith.constant 0 : i32
    %c0_i32_0 = arith.constant 0 : i32
    %c0_i32_1 = arith.constant 0 : i32
    return %c0_i32, %c0_i32_0 : i32, i32
  }
  func.func @transform_2(%arg0: i32) -> (i32, i32) {
    %c0_i32 = arith.constant 0 : i32
    %c0_i32_0 = arith.constant 0 : i32
    %c0_i32_1 = arith.constant 0 : i32
    return %c0_i32, %c0_i32_0 : i32, i32
  }
  func.func @transform_3(%arg0: i32) -> (i32, i32) {
    %c0_i32 = arith.constant 0 : i32
    %c0_i32_0 = arith.constant 0 : i32
    return %arg0, %c0_i32 : i32, i32
  }
}

</mosaic_0001>

<bundles_post_ra>
// kernel: tpu_custom_call.1
= control target key start
LH: loop header
LB: loop body
LE: loop exit
PB: predicated region body
PF: predicated region fallthrough
CT: control target
= control target key end

     0   :  { %8 = vsyncpa [#allocation3], 0  ;;  %s1452_s0 = inlined_call_operand.vmem [shape: bf16[512,72], index: 0, kind: input, shape index: {}]   ;;  %s1453_s1 = inlined_call_operand.vmem [shape: bf16[72,128], index: 1, kind: input, shape index: {}]   ;;  %s1454_s2 = inlined_call_operand.vmem [shape: f32[1,128], index: 2, kind: input, shape index: {}]   ;;  %s1455_s3 = inlined_call_operand.hbm [shape: bf16[512,128], index: 3, kind: output, shape index: {}]  }
   0x1   :  { %10 = vsyncpa [#allocation3 + $0x1], 0  ;;  %s1242_s12 = smov 0   ;;  %s1244_s13 = smov 0  }
   0x2   :  { %s1246_s14 = smov 0   ;;  %s1248_s15 = smov 0  }
   0x3 LB: > { %s1263_s16 = sadd.s32 4294967295, %s1217_s15   ;;  %s810_s17 = sadd.s32 4294967294, %s1217_s15   ;;  %s1217_s15 = sphi %s1248_s15, %s1461_s15   ;;  %s1213_s14 = sphi %s1246_s14, %s1460_s14   ;;  %s1209_s13 = sphi %s1244_s13, %s1459_s13   ;;  %s1205_s12 = sphi %s1242_s12, %s1458_s12  }
   0x4   : > { %s1267_s18 = sadd.s32 1, %s1217_s15   ;;  %s91_s19 = sadd.s32 1, %s1213_s14 }
   0x5   : > { %s88_s20 = ssub.s32 %s1217_s15, %s1267_s18  ;;  %p101_p0 = scmp.ne.s32.totalorder %s1213_s14, %s1209_s13 }
   0x6   : > { %p89_p1 = scmp.eq.s32.totalorder %s88_s20, 0  ;;  %p102_p2 = scmp.eq.s32.totalorder %s1263_s16, 1 }
   0x7   : > { %p107_p3 = scmp.ne.s32.totalorder %s1209_s13, %s1205_s12  ;;  %p108_p4 = scmp.eq.s32.totalorder %s810_s17, 1 }
   0x8   : > { %s1278_s21 = scalar_select %p89_p1, %s1213_s14, %s91_s19  }
   0x9   : > { %p1280_p5 = por %p102_p2, %p101_p0  ;;  %p1284_p6 = por %p108_p4, %p107_p3 }
   0xa   : > { %p813_p7 = scmp.ge.s32.totalorder %s1217_s15, 1  ;;  %p141_p8 = scmp.lt.s32.totalorder %s1217_s15, 3 }
   0xc   : > { %p142_p9 = pnand %p813_p7, %p141_p8 }
   0xd   : > { %s815_s28 = sshll.u32 (!%p142_p9), %s1263_s16, 5  ;;  %s162_s20 = sand.u32 (!%p142_p9), 1, %s1209_s13  }
   0xe   : > { %145 = sbr.rel (%p142_p9) target bundleno = 283 (0x11b), region = 32  ;;  %p166_p10 = scmp.lt.s32.totalorder (!%p142_p9), %s815_s28, 63 }
   0xf   : > { %s814_s24 = sshll.u32 (!%p142_p9), %s162_s20, 7  ;;  %s924_s26 = sshll.u32 (!%p142_p9), %s1263_s16, 11 }
  0x10   : > { %s1361_s25 = scalar_lea.vmem (!%p142_p9), [#allocation2], %s814_s24  ;;  %s1402_s30 = scalar_lea.hbm (!%p142_p9), %s1455_s3, %s924_s26 }
  0x11   : > { %s748_s27 = sshll.u32 (!%p142_p9), %s1361_s25, 4  ;;  %s1412_s16 = scalar_lea.sflag (!%p142_p9), [#allocation3], %s162_s20  ;;  %s1404_s27 = int_to_ptr.vmem [resolvable:$true] %s748_s27 }
  0x12   : > { %s1157_s4 = scalar_lea.vmem (!%p142_p9), %s1404_s27, 2048  ;;  %s1219_s5 = smov (!%p142_p9), [#allocation2]  }
  0x13   : > { %v1136_v0 = vld [vmem:[%s1453_s1 + $0x20] ss:$0 sps:$4 sm:$0xff]   ;;  %vm377_vm0 = vcmask 1043456   ;;  %v1137_v1 = vld [vmem:[%s1453_s1 + $0x18] sm:$0xff]   ;;  %v1138_v3 = vld [vmem:[%s1453_s1 + $0x10] sm:$0xff]   ;;  %s1463_s28 = smov (!%p166_p10, %s815_s28), 63  ;;  %p1158_p11 = scmp.ne.s32.totalorder %s1404_s27, %s1157_s4 }
  0x14   : > { %1093 = vmatprep.subr.msk.bf16.mxu0 %vm377_vm0, %v1136_v0  ;;  %1094 = vmatprep.subr.msk.bf16.mxu1 %vm377_vm0, %v1136_v0  ;;  %v379_v2 = vsel %vm377_vm0, %v1136_v0, 0  ;;  %v1139_v4 = vld [vmem:[%s1453_s1 + $0x8] sm:$0xff]   ;;  %s816_s6 = sshll.u32 %s1463_s28, 2  ;;  %vm328_vm1 = vcmask 588800   ;;  %v1140_v7 = vld [vmem:[%s1453_s1] sm:$0xff]  }
  0x15   : > { %1042 = vmatpush3.bf16.msra.mxu0 %v379_v2  ;;  %1088 = vmatpush3.bf16.msra.mxu1 %v379_v2  ;;  %s1306_s9 = scalar_lea.vmem %s1452_s0, %s816_s6  ;;  %v1346_v22 = vld [vmem:[%s1454_s2] ss:$0 sm:$0xff]  ;;  %p1159_p12 = pnand %p1158_p11, %p1280_p5 }
  0x16   : > { %1043 = vmatprep.subr.bf16.mxu0 %v1137_v1  ;;  %1084 = vmatprep.subr.bf16.mxu1 %v1137_v1  ;;  %v1141_v5 = vld [vmem:[%s1306_s9] sm:$0xff]   ;;  %v1143_v8 = vld [vmem:[%s1306_s9 + $0x8] sm:$0xff]   ;;  %v1145_v10 = vld [vmem:[%s1306_s9 + $0x10] sm:$0xff]   ;;  %s1161_s6 = sshll.u32 %s1219_s5, 4  ;;  %s1162_s6 = int_to_ptr.vmem [resolvable:$false] %s1161_s6 }
  0x17   : > { %v1142_v6 = vld [vmem:[%s1306_s9 + $0x40] sm:$0xff]   ;;  %1051 = vmatprep.mubr.msk.bf16.mxu0 %vm328_vm1, %v1141_v5  ;;  %v1144_v9 = vld [vmem:[%s1306_s9 + $0x48] sm:$0xff]   ;;  %v1146_v11 = vld [vmem:[%s1306_s9 + $0x50] sm:$0xff]   ;;  %p1160_p13 = pneg %p1159_p12  ;;  %s1163_s7 = scalar_lea.vmem %s1162_s6, 4096 }
  0x18   : > { %1067 = vmatprep.mubr.msk.bf16.mxu1 %vm328_vm1, %v1142_v6  ;;  %v1147_v12 = vld [vmem:[%s1306_s9 + $0x18] sm:$0xff]   ;;  %v1149_v14 = vld [vmem:[%s1306_s9 + $0x20] sm:$0xff]   ;;  %v1151_v16 = vld [vmem:[%s1306_s9 + $0x28] sm:$0xff]   ;;  %p1164_p0 = scmp.lt.s32.totalorder %s1404_s27, %s1162_s6  ;;  %p1165_p1 = scmp.lt.s32.totalorder %s1163_s7, %s1157_s4 }
  0x19   : > { %1044 = vmatpush3.bf16.msra.mxu0 %v1137_v1  ;;  %1089 = vmatpush3.bf16.msra.mxu1 %v1137_v1  ;;  %v1148_v13 = vld [vmem:[%s1306_s9 + $0x58] sm:$0xff]   ;;  %v1150_v15 = vld [vmem:[%s1306_s9 + $0x60] sm:$0xff]   ;;  %v1152_v17 = vld [vmem:[%s1306_s9 + $0x68] sm:$0xff]  }
  0x1a   : > { %1045 = vmatprep.subr.bf16.mxu0 %v1138_v3  ;;  %1085 = vmatprep.subr.bf16.mxu1 %v1138_v3  ;;  %v1153_v18 = vld [vmem:[%s1306_s9 + $0x30] sm:$0xff]   ;;  %v1155_v20 = vld [vmem:[%s1306_s9 + $0x38] sm:$0xff]   ;;  %p1166_p2 = por %p1165_p1, %p1164_p0 }
  0x1b   : > { %v1154_v19 = vld [vmem:[%s1306_s9 + $0x70] sm:$0xff]   ;;  %v1156_v21 = vld [vmem:[%s1306_s9 + $0x78] sm:$0xff]  }
  0x1c   : > { %p1167_p3 = pnand %p1166_p2, %p1160_p13 }
  0x1d   : > { %1046 = vmatpush3.bf16.msra.mxu0 %v1138_v3  ;;  %1090 = vmatpush3.bf16.msra.mxu1 %v1138_v3 }
  0x1e   : > { %1047 = vmatprep.subr.bf16.mxu0 %v1139_v4  ;;  %1086 = vmatprep.subr.bf16.mxu1 %v1139_v4 }
  0x21   : > { %1048 = vmatpush3.bf16.msra.mxu0 %v1139_v4  ;;  %1091 = vmatpush3.bf16.msra.mxu1 %v1139_v4 }
  0x22   : > { %1049 = vmatprep.subr.bf16.mxu0 %v1140_v7  ;;  %1087 = vmatprep.subr.bf16.mxu1 %v1140_v7 }
  0x25   : > { %1050 = vmatpush3.bf16.msra.mxu0 %v1140_v7  ;;  %1092 = vmatpush3.bf16.msra.mxu1 %v1140_v7 }
  0x28   : > { %1052 = vmatmul.mubr.msk.bf16.vlgmr.msra.gmra.mxu0 %vm328_vm1, %v1143_v8  ;;  %1068 = vmatmul.mubr.msk.bf16.vlgmr.msra.gmra.mxu1 %vm328_vm1, %v1144_v9 }
  0x29   : > { %1055 = vmatprep.mubr.msk.bf16.mxu0 %vm328_vm1, %v1145_v10  ;;  %1071 = vmatprep.mubr.msk.bf16.mxu1 %vm328_vm1, %v1146_v11 }
  0x30   : > { %1056 = vmatmul.mubr.msk.bf16.gmra.mxu0 %vm328_vm1, %v1147_v12  ;;  %1072 = vmatmul.mubr.msk.bf16.gmra.mxu1 %vm328_vm1, %v1148_v13 }
  0x31   : > { %1059 = vmatprep.mubr.msk.bf16.mxu0 %vm328_vm1, %v1149_v14  ;;  %1075 = vmatprep.mubr.msk.bf16.mxu1 %vm328_vm1, %v1150_v15 }
  0x38   : > { %1060 = vmatmul.mubr.msk.bf16.gmra.mxu0 %vm328_vm1, %v1151_v16  ;;  %1076 = vmatmul.mubr.msk.bf16.gmra.mxu1 %vm328_vm1, %v1152_v17 }
  0x39   : > { %1063 = vmatprep.mubr.msk.bf16.mxu0 %vm328_vm1, %v1153_v18  ;;  %1079 = vmatprep.mubr.msk.bf16.mxu1 %vm328_vm1, %v1154_v19 }
  0x40   : > { %1064 = vmatmul.mubr.msk.bf16.gmra.mxu0 %vm328_vm1, %v1155_v20  ;;  %1080 = vmatmul.mubr.msk.bf16.gmra.mxu1 %vm328_vm1, %v1156_v21 }
  0xe8   : > { %v1053_v23 = vpop.f32.mrf.mxu0  ;;  %v1069_v24 = vpop.f32.mrf.mxu1 }
  0xe9   : > { %v424_v25 = vadd.f32 %v1053_v23, %v1346_v22  ;;  %v488_v26 = vadd.f32 %v1069_v24, %v1346_v22 }
  0xea   : > { %v415_v27 = vpop.f32.mrf.mxu0  ;;  %v479_v28 = vpop.f32.mrf.mxu1 }
  0xeb   : > { %v416_v29 = vadd.f32 %v1346_v22, %v415_v27  ;;  %v480_v30 = vadd.f32 %v1346_v22, %v479_v28  ;;  %v544_v35 = vmax.f32 %v424_v25, 0.0  ;;  %v560_v36 = vmax.f32 %v488_v26, 0.0 }
  0xec   : > { %v1054_v31 = vpop.f32.mrf.mxu0  ;;  %v1070_v32 = vpop.f32.mrf.mxu1 }
  0xed   : > { %v427_v33 = vadd.f32 %v1054_v31, %v1346_v22  ;;  %v491_v34 = vadd.f32 %v1070_v32, %v1346_v22  ;;  %v542_v43 = vmax.f32 %v416_v29, 0.0  ;;  %v558_v44 = vmax.f32 %v480_v30, 0.0 }
  0xee   : > { %v418_v37 = vpop.f32.mrf.mxu0  ;;  %v482_v38 = vpop.f32.mrf.mxu1 }
  0xef   : > { %v545_v39 = vmax.f32 %v427_v33, 0.0  ;;  %v561_v40 = vmax.f32 %v491_v34, 0.0  ;;  %v419_v41 = vadd.f32 %v1346_v22, %v418_v37  ;;  %v483_v42 = vadd.f32 %v1346_v22, %v482_v38 }
  0xf0   : > { %v1057_v45 = vpop.f32.mrf.mxu0  ;;  %v1073_v46 = vpop.f32.mrf.mxu1 }
  0xf1   : > { %v933_v47 = vpack.c.bf16 %v545_v39, %v544_v35  ;;  %v973_v48 = vpack.c.bf16 %v561_v40, %v560_v36  ;;  %v543_v49 = vmax.f32 %v419_v41, 0.0  ;;  %v559_v50 = vmax.f32 %v483_v42, 0.0 }
  0xf2   : > { %v440_v51 = vadd.f32 %v1057_v45, %v1346_v22  ;;  %v504_v52 = vadd.f32 %v1073_v46, %v1346_v22  ;;  %v431_v53 = vpop.f32.mrf.mxu0  ;;  %v495_v54 = vpop.f32.mrf.mxu1 }
  0xf3   : > { %1005 = vst [vmem:[%s1361_s25 + $0x8] sm:$0xff] %v933_v47   ;;  %1013 = vst [vmem:[%s1361_s25 + $0x48] sm:$0xff] %v973_v48   ;;  %v928_v55 = vpack.c.bf16 %v543_v49, %v542_v43  ;;  %v968_v56 = vpack.c.bf16 %v559_v50, %v558_v44  ;;  %v432_v57 = vadd.f32 %v1346_v22, %v431_v53 }
  0xf4   : > { %v496_v58 = vadd.f32 %v1346_v22, %v495_v54  ;;  %v1058_v59 = vpop.f32.mrf.mxu0  ;;  %v1074_v60 = vpop.f32.mrf.mxu1  ;;  %v548_v63 = vmax.f32 %v440_v51, 0.0  ;;  %v564_v0 = vmax.f32 %v504_v52, 0.0 }
  0xf5   : > { %929 = vst [vmem:[%s1361_s25] sm:$0xff] %v928_v55   ;;  %1012 = vst [vmem:[%s1361_s25 + $0x40] sm:$0xff] %v968_v56   ;;  %v443_v61 = vadd.f32 %v1058_v59, %v1346_v22  ;;  %v507_v62 = vadd.f32 %v1074_v60, %v1346_v22  ;;  %v546_v7 = vmax.f32 %v432_v57, 0.0 }
  0xf6   : > { %v434_v1 = vpop.f32.mrf.mxu0  ;;  %v498_v2 = vpop.f32.mrf.mxu1  ;;  %v562_v8 = vmax.f32 %v496_v58, 0.0 }
  0xf7   : > { %v549_v3 = vmax.f32 %v443_v61, 0.0  ;;  %v565_v4 = vmax.f32 %v507_v62, 0.0  ;;  %v435_v5 = vadd.f32 %v1346_v22, %v434_v1  ;;  %v499_v6 = vadd.f32 %v1346_v22, %v498_v2 }
  0xf8   : > { %v1061_v9 = vpop.f32.mrf.mxu0  ;;  %v1077_v10 = vpop.f32.mrf.mxu1 }
  0xf9   : > { %v943_v11 = vpack.c.bf16 %v549_v3, %v548_v63  ;;  %v983_v12 = vpack.c.bf16 %v565_v4, %v564_v0  ;;  %v547_v13 = vmax.f32 %v435_v5, 0.0  ;;  %v563_v14 = vmax.f32 %v499_v6, 0.0 }
  0xfa   : > { %v456_v15 = vadd.f32 %v1061_v9, %v1346_v22  ;;  %v520_v16 = vadd.f32 %v1077_v10, %v1346_v22  ;;  %v447_v17 = vpop.f32.mrf.mxu0  ;;  %v511_v18 = vpop.f32.mrf.mxu1 }
  0xfb   : > { %1007 = vst [vmem:[%s1361_s25 + $0x18] sm:$0xff] %v943_v11   ;;  %1015 = vst [vmem:[%s1361_s25 + $0x58] sm:$0xff] %v983_v12   ;;  %v938_v19 = vpack.c.bf16 %v547_v13, %v546_v7  ;;  %v978_v20 = vpack.c.bf16 %v563_v14, %v562_v8  ;;  %v448_v21 = vadd.f32 %v1346_v22, %v447_v17 }
  0xfc   : > { %v512_v23 = vadd.f32 %v1346_v22, %v511_v18  ;;  %v1062_v24 = vpop.f32.mrf.mxu0  ;;  %v1078_v25 = vpop.f32.mrf.mxu1  ;;  %v552_v28 = vmax.f32 %v456_v15, 0.0  ;;  %v568_v29 = vmax.f32 %v520_v16, 0.0 }
  0xfd   : > { %1006 = vst [vmem:[%s1361_s25 + $0x10] sm:$0xff] %v938_v19   ;;  %1014 = vst [vmem:[%s1361_s25 + $0x50] sm:$0xff] %v978_v20   ;;  %v459_v26 = vadd.f32 %v1062_v24, %v1346_v22  ;;  %v523_v27 = vadd.f32 %v1078_v25, %v1346_v22  ;;  %v550_v36 = vmax.f32 %v448_v21, 0.0 }
  0xfe   : > { %v450_v30 = vpop.f32.mrf.mxu0  ;;  %v514_v31 = vpop.f32.mrf.mxu1  ;;  %v566_v37 = vmax.f32 %v512_v23, 0.0 }
  0xff   : > { %v553_v32 = vmax.f32 %v459_v26, 0.0  ;;  %v569_v33 = vmax.f32 %v523_v27, 0.0  ;;  %v451_v34 = vadd.f32 %v1346_v22, %v450_v30  ;;  %v515_v35 = vadd.f32 %v1346_v22, %v514_v31 }
 0x100   : > { %v1065_v38 = vpop.f32.mrf.mxu0  ;;  %v1081_v39 = vpop.f32.mrf.mxu1 }
 0x101   : > { %v953_v40 = vpack.c.bf16 %v553_v32, %v552_v28  ;;  %v993_v41 = vpack.c.bf16 %v569_v33, %v568_v29  ;;  %v551_v42 = vmax.f32 %v451_v34, 0.0  ;;  %v567_v43 = vmax.f32 %v515_v35, 0.0 }
 0x102   : > { %v472_v44 = vadd.f32 %v1065_v38, %v1346_v22  ;;  %v536_v45 = vadd.f32 %v1081_v39, %v1346_v22  ;;  %v463_v46 = vpop.f32.mrf.mxu0  ;;  %v527_v47 = vpop.f32.mrf.mxu1 }
 0x103   : > { %1009 = vst [vmem:[%s1361_s25 + $0x28] sm:$0xff] %v953_v40   ;;  %1017 = vst [vmem:[%s1361_s25 + $0x68] sm:$0xff] %v993_v41   ;;  %v948_v48 = vpack.c.bf16 %v551_v42, %v550_v36  ;;  %v988_v49 = vpack.c.bf16 %v567_v43, %v566_v37  ;;  %v464_v50 = vadd.f32 %v1346_v22, %v463_v46 }
 0x104   : > { %v528_v51 = vadd.f32 %v1346_v22, %v527_v47  ;;  %v1066_v52 = vpop.f32.mrf.mxu0  ;;  %v1082_v53 = vpop.f32.mrf.mxu1  ;;  %v556_v56 = vmax.f32 %v472_v44, 0.0  ;;  %v572_v57 = vmax.f32 %v536_v45, 0.0 }
 0x105   : > { %1008 = vst [vmem:[%s1361_s25 + $0x20] sm:$0xff] %v948_v48   ;;  %1016 = vst [vmem:[%s1361_s25 + $0x60] sm:$0xff] %v988_v49   ;;  %v475_v54 = vadd.f32 %v1066_v52, %v1346_v22  ;;  %v539_v55 = vadd.f32 %v1082_v53, %v1346_v22  ;;  %v554_v0 = vmax.f32 %v464_v50, 0.0 }
 0x106   : > { %v466_v58 = vpop.f32.mrf.mxu0  ;;  %v530_v59 = vpop.f32.mrf.mxu1  ;;  %v570_v1 = vmax.f32 %v528_v51, 0.0 }
 0x107   : > { %v557_v60 = vmax.f32 %v475_v54, 0.0  ;;  %v573_v61 = vmax.f32 %v539_v55, 0.0  ;;  %v467_v62 = vadd.f32 %v1346_v22, %v466_v58  ;;  %v531_v63 = vadd.f32 %v1346_v22, %v530_v59 }
 0x109   : > { %v963_v2 = vpack.c.bf16 %v557_v60, %v556_v56  ;;  %v1003_v3 = vpack.c.bf16 %v573_v61, %v572_v57  ;;  %v555_v4 = vmax.f32 %v467_v62, 0.0  ;;  %v571_v5 = vmax.f32 %v531_v63, 0.0 }
 0x10b   : > { %1011 = vst [vmem:[%s1361_s25 + $0x38] sm:$0xff] %v963_v2   ;;  %1019 = vst [vmem:[%s1361_s25 + $0x78] sm:$0xff] %v1003_v3   ;;  %v958_v22 = vpack.c.bf16 %v555_v4, %v554_v0  ;;  %v998_v6 = vpack.c.bf16 %v571_v5, %v570_v1 }
 0x10d   : > { %1010 = vst [vmem:[%s1361_s25 + $0x30] sm:$0xff] %v958_v22   ;;  %1018 = vst [vmem:[%s1361_s25 + $0x70] sm:$0xff] %v998_v6  }
 0x10e   : > { %1170 = shalt.err (!%p1167_p3)
}
 0x10f   : > { %s1171_s8 = scalar_lea.hbm %s1402_s30, 2048  ;;  %s1175_s11 = scalar_lea.hbm %s1455_s3, 4096 }
 0x110   : > { %p1172_p4 = scmp.ne.s32.totalorder %s1402_s30, %s1171_s8  ;;  %p1176_p9 = scmp.lt.s32.totalorder %s1402_s30, %s1455_s3 }
 0x111   : > { %p1177_p10 = scmp.lt.s32.totalorder %s1175_s11, %s1171_s8 }
 0x112   : > { %p1173_p7 = pnand %p1172_p4, %p1280_p5 }
 0x113   : > { %p1178_p11 = por %p1177_p10, %p1176_p9 }
 0x114   : > { %p1174_p8 = pneg %p1173_p7 }
 0x116   : > { %p1179_p12 = pnand %p1178_p11, %p1174_p8 }
 0x118   : > { %1182 = shalt.err (!%p1179_p12)
}
 0x119   : > { %s1220_s20 = smov 64   ;;  %s1221_s24 = smov 4  }
 0x11a   : > { %1095 = dma.vmem_to_hbm [thread:$0]  (%p1280_p5), %s1404_s27, 2048, %s1402_s30, %s1412_s16, %s1220_s20, %s1220_s20, %s1221_s24  }
 0x11b PF: > { %p1101_p13 = scmp.ge.s32.totalorder %s1217_s15, 2  ;;  %s763_s25 = sand.u32 1, %s1205_s12  }
 0x11c   : > { %s764_s26 = scalar_lea.sflag [#allocation3], %s763_s25 }
 0x11d   : > { %p1098_p0 = pnand %p1101_p13, %p1284_p6 }
 0x11f   : > { %p1099_p1 = pneg %p1098_p0 }
 0x121   : > { %1200 = dma.done.wait (%p1099_p1), %s764_s26, 2048  }
 0x122   : > { %1202 = vsyncadd (%p1099_p1), %s764_s26, 4294965248  ;;  %p13_p2 = scmp.ge.s32.totalorder %s1267_s18, 4   ;;  %s1458_s12 = smov %s1209_s13 }
 0x123   : > { %s1459_s13 = smov %s1213_s14  ;;  %s1460_s14 = smov %s1278_s21 }
 0x124   : > { %s1461_s15 = smov %s1267_s18  ;;  %15 = sbr.rel (!%p13_p2) target bundleno = 3 (0x3), region = 67 }
 0x129   :  { %769 = vsyncpa [#allocation3], 1 }
 0x12a   :  { %771 = vsyncpa [#allocation3 + $0x1], 1 }

</bundles_post_ra>
